<compile_context>
chip_gen: v7x
topology: tpu7x:2x2x1
jax: 0.10.0
libtpu: 0.0.40
codegen_flags: <defaults>
</compile_context>

<pallas_src>
import jax
import jax.numpy as jnp
from jax.experimental import pallas as pl
from jax.experimental.pallas import tpu as pltpu

LANE = 128  # lane width (last dim)


def _round_up(x, m):
    return (x + m - 1) // m * m


def _cdiv(a, b):
    return (a + b - 1) // b


def _sublane_quantum(dtype):
    item = jnp.dtype(dtype).itemsize
    return 8 * (4 // item)  # 8 for f32, 16 for bf16


def _padded_tile_bytes(rows, cols, dtype):
    """VMEM footprint of a (rows, cols) buffer after (sublane, 128)-tile padding."""
    item = jnp.dtype(dtype).itemsize
    return _round_up(rows, _sublane_quantum(dtype)) * _round_up(cols, LANE) * item


def _choose_batch_tiling(B, b_tile_max, sub_q, split_threshold=128):
    """Pick (b_tile, b_pad).  Tiles are sublane-rounded; large batches always get an even,
    >=2-step grid so the 'parallel' batch axis shards across both TensorCores on v7x."""
    if B < split_threshold:
        b_tile = _round_up(max(B, sub_q), sub_q)
        return b_tile, b_tile
    n_steps = max(2, _cdiv(B, b_tile_max))
    if n_steps % 2:
        n_steps += 1
    b_tile = _round_up(_cdiv(B, n_steps), sub_q)
    return b_tile, n_steps * b_tile


def dqn_kernel(x_ref, w1_ref, b1_ref, w2_ref, b2_ref, w3_ref, b3_ref, o_ref):
    # layer1 + ReLU  (MXU matmul, f32 accumulation; bias/ReLU in f32 on the VPU)
    h1 = jnp.dot(x_ref[...], w1_ref[...], preferred_element_type=jnp.float32)
    h1 = jnp.maximum(h1 + b1_ref[...], 0.0)
    # layer2 + ReLU
    h2 = jnp.dot(h1.astype(w2_ref.dtype), w2_ref[...], preferred_element_type=jnp.float32)
    h2 = jnp.maximum(h2 + b2_ref[...], 0.0)
    # layer3 (Q-values, no activation); o_ref only has the real n_out columns.
    q = jnp.dot(h2.astype(w3_ref.dtype), w3_ref[...], preferred_element_type=jnp.float32)
    o_ref[...] = (q + b3_ref[...]).astype(o_ref.dtype)


def dqn_forward(x, params, *, b_tile_max=1024, use_bf16=True):
    """x: [B, f_in] float32. params: dict w1,b1,w2,b2,w3,b3 (w*: [in,out], b*: [1,out])."""
    w1, b1 = params["w1"], params["b1"]
    w2, b2 = params["w2"], params["b2"]
    w3, b3 = params["w3"], params["b3"]

    B, f_in = x.shape
    hidden = w1.shape[1]
    n_out = w3.shape[1]

    mm_dtype = jnp.bfloat16 if use_bf16 else jnp.float32
    sub_q = _sublane_quantum(mm_dtype)
    b_tile, b_pad = _choose_batch_tiling(B, b_tile_max, sub_q)
    grid = (b_pad // b_tile,)

    # Keep x at its real (tiny) feature width -- no lane padding.  Only the batch axis is
    # zero-padded up to a whole number of sublane-rounded tiles.
    xp = x.astype(mm_dtype)
    if b_pad != B:
        xp = jnp.pad(xp, ((0, b_pad - B), (0, 0)))
    w1m, w2m, w3m = (w.astype(mm_dtype) for w in (w1, w2, w3))
    b1f, b2f, b3f = (b.astype(jnp.float32) for b in (b1, b2, b3))

    # Tight VMEM budget: double-buffered x/out tiles, (default) double-buffered resident
    # weights, f32 intermediates, small margin.  Tile-padded sizes so it never undershoots.
    x_tile_b = _padded_tile_bytes(b_tile, f_in, mm_dtype)
    o_tile_b = _padded_tile_bytes(b_tile, n_out, jnp.float32)
    w_bytes = (_padded_tile_bytes(f_in, hidden, mm_dtype)
               + _padded_tile_bytes(hidden, hidden, mm_dtype)
               + _padded_tile_bytes(hidden, n_out, mm_dtype)
               + 2 * _padded_tile_bytes(1, hidden, jnp.float32)
               + _padded_tile_bytes(1, n_out, jnp.float32))
    interm_b = 3 * _padded_tile_bytes(b_tile, hidden, jnp.float32)
    vmem_limit = int(2 * (x_tile_b + o_tile_b) + 2 * w_bytes + interm_b + (2 << 20))

    itm = jnp.dtype(mm_dtype).itemsize
    flops = 2 * b_pad * (f_in * hidden + hidden * hidden + hidden * n_out)
    bytes_accessed = int(b_pad * f_in * itm + b_pad * n_out * 4
                         + (f_in * hidden + hidden * hidden + hidden * n_out) * itm
                         + (2 * hidden + n_out) * 4)

    const2 = lambda i: (0, 0)
    out = pl.pallas_call(
        dqn_kernel,
        out_shape=jax.ShapeDtypeStruct((b_pad, n_out), jnp.float32),
        grid=grid,
        in_specs=[
            pl.BlockSpec((b_tile, f_in), lambda i: (i, 0)),   # x: streamed over batch tiles
            pl.BlockSpec((f_in, hidden), const2),             # weights/biases: VMEM-resident
            pl.BlockSpec((1, hidden), const2),
            pl.BlockSpec((hidden, hidden), const2),
            pl.BlockSpec((1, hidden), const2),
            pl.BlockSpec((hidden, n_out), const2),
            pl.BlockSpec((1, n_out), const2),
        ],
        out_specs=pl.BlockSpec((b_tile, n_out), lambda i: (i, 0)),
        compiler_params=pltpu.CompilerParams(
            dimension_semantics=("parallel",),   # batch tiles shard across v7x's 2 TCs
            vmem_limit_bytes=vmem_limit,
        ),
        cost_estimate=pl.CostEstimate(
            flops=flops, transcendentals=0, bytes_accessed=bytes_accessed),
    )(xp, w1m, b1f, w2m, b2f, w3m, b3f)

    # Padded batch rows hold garbage Q-values (zero input still picks up biases through ReLU);
    # always slice before anything reduces over the batch.
    return out[:B] if b_pad != B else out


def init_dqn_params(key, n_in, n_out, hidden=128):
    """Deterministic init mimicking nn.Linear's uniform(-1/sqrt(fan_in), 1/sqrt(fan_in))."""
    ks = jax.random.split(key, 6)

    def linear(kw, kb, fan_in, fan_out):
        bound = 1.0 / jnp.sqrt(jnp.float32(fan_in))
        w = jax.random.uniform(kw, (fan_in, fan_out), jnp.float32, -bound, bound)
        b = jax.random.uniform(kb, (1, fan_out), jnp.float32, -bound, bound)
        return w, b

    w1, b1 = linear(ks[0], ks[1], n_in, hidden)
    w2, b2 = linear(ks[2], ks[3], hidden, hidden)
    w3, b3 = linear(ks[4], ks[5], hidden, n_out)
    return {"w1": w1, "b1": b1, "w2": w2, "b2": b2, "w3": w3, "b3": b3}


def dqn_reference(x, p):
    h1 = jnp.maximum(x @ p["w1"] + p["b1"], 0.0)
    h2 = jnp.maximum(h1 @ p["w2"] + p["b2"], 0.0)
    return h2 @ p["w3"] + p["b3"]


if __name__ == "__main__":
    key = jax.random.PRNGKey(0)
    k_x, k_p, k_x2 = jax.random.split(key, 3)

    # CartPole-like: 4 observations -> 2 Q-values
    batch, n_in, n_out = 2, 4, 2
    x = jax.random.normal(k_x, (batch, n_in), dtype=jnp.float32)
    params = init_dqn_params(k_p, n_in, n_out)

    # f32 path, tiny batch (single 8-row tile).
    out = jax.block_until_ready(dqn_forward(x, params, use_bf16=False))
    ref = dqn_reference(x, params)
    assert out.shape == (batch, n_out)
    assert jnp.allclose(out, ref, atol=1e-5, rtol=1e-5), "f32 small-batch mismatch"

    # Replay-buffer-sized batch: 2-step parallel grid (2x152 rows), padded tail, f32 path.
    big_batch = 300
    xb = jax.random.normal(k_x2, (big_batch, n_in), dtype=jnp.float32)
    out_b = jax.block_until_ready(dqn_forward(xb, params, use_bf16=False))
    ref_b = dqn_reference(xb, params)
    assert out_b.shape == (big_batch, n_out)
    assert jnp.allclose(out_b, ref_b, atol=1e-5, rtol=1e-5), "f32 tiled-batch mismatch"

    # Default bf16 fast path (f32 accumulation) -- halves streamed bytes on all generations.
    out_bf = jax.block_until_ready(dqn_forward(xb, params))
    assert out_bf.shape == (big_batch, n_out)
    assert jnp.allclose(out_bf, ref_b, atol=5e-2, rtol=5e-2), "bf16 path mismatch"

    print("KERNEL_OK")
</pallas_src>

<mosaic_0001>
module attributes {stable_mosaic.version = 11 : i64} {
  func.func @dqn_kernel(%arg0: i32, %arg1: memref<8x4xf32, #tpu.memory_space<vmem>>, %arg2: memref<4x128xf32, #tpu.memory_space<vmem>>, %arg3: memref<1x128xf32, #tpu.memory_space<vmem>>, %arg4: memref<128x128xf32, #tpu.memory_space<vmem>>, %arg5: memref<1x128xf32, #tpu.memory_space<vmem>>, %arg6: memref<128x2xf32, #tpu.memory_space<vmem>>, %arg7: memref<1x2xf32, #tpu.memory_space<vmem>>, %arg8: memref<8x2xf32, #tpu.memory_space<vmem>>) attributes {dimension_semantics = [#tpu.dimension_semantics<parallel>], iteration_bounds = array<i64: 1>, scalar_prefetch = 0 : i64, scratch_operands = 0 : i64, tpu.core_type = #tpu.core_type<tc>, window_params = [{transform_indices = @transform_0, window_bounds = array<i64: 8, 4>}, {pipeline_mode = #tpu.pipeline_mode<synchronous>, transform_indices = @transform_1, window_bounds = array<i64: 4, 128>}, {pipeline_mode = #tpu.pipeline_mode<synchronous>, transform_indices = @transform_2, window_bounds = array<i64: 1, 128>}, {pipeline_mode = #tpu.pipeline_mode<synchronous>, transform_indices = @transform_3, window_bounds = array<i64: 128, 128>}, {pipeline_mode = #tpu.pipeline_mode<synchronous>, transform_indices = @transform_4, window_bounds = array<i64: 1, 128>}, {pipeline_mode = #tpu.pipeline_mode<synchronous>, transform_indices = @transform_5, window_bounds = array<i64: 128, 2>}, {pipeline_mode = #tpu.pipeline_mode<synchronous>, transform_indices = @transform_6, window_bounds = array<i64: 1, 2>}, {transform_indices = @transform_7, window_bounds = array<i64: 8, 2>}]} {
    %c0 = arith.constant 0 : index
    %c0_0 = arith.constant 0 : index
    %0 = vector.load %arg1[%c0, %c0_0] : memref<8x4xf32, #tpu.memory_space<vmem>>, vector<8x4xf32>
    %c0_1 = arith.constant 0 : index
    %c0_2 = arith.constant 0 : index
    %1 = vector.load %arg2[%c0_1, %c0_2] : memref<4x128xf32, #tpu.memory_space<vmem>>, vector<4x128xf32>
    %cst = arith.constant dense<0.000000e+00> : vector<8x128xf32>
    %2 = tpu.matmul %0, %1, %cst {dimension_numbers = #tpu.dot_dimension_numbers<[1], [0], [0], [1], [0, 0, 1, 1], [], []>} : vector<8x4xf32>, vector<4x128xf32>, vector<8x128xf32> -> vector<8x128xf32>
    %c0_3 = arith.constant 0 : index
    %c0_4 = arith.constant 0 : index
    %3 = vector.load %arg3[%c0_3, %c0_4] : memref<1x128xf32, #tpu.memory_space<vmem>>, vector<1x128xf32>
    %4 = vector.broadcast %3 : vector<1x128xf32> to vector<8x128xf32>
    %5 = arith.addf %2, %4 : vector<8x128xf32>
    %cst_5 = arith.constant 0.000000e+00 : f32
    %6 = vector.broadcast %cst_5 : f32 to vector<8x128xf32>
    %7 = arith.maximumf %5, %6 : vector<8x128xf32>
    %c0_6 = arith.constant 0 : index
    %c0_7 = arith.constant 0 : index
    %8 = vector.load %arg4[%c0_6, %c0_7] : memref<128x128xf32, #tpu.memory_space<vmem>>, vector<128x128xf32>
    %cst_8 = arith.constant dense<0.000000e+00> : vector<8x128xf32>
    %9 = tpu.matmul %7, %8, %cst_8 {dimension_numbers = #tpu.dot_dimension_numbers<[1], [0], [0], [1], [0, 0, 1, 1], [], []>} : vector<8x128xf32>, vector<128x128xf32>, vector<8x128xf32> -> vector<8x128xf32>
    %c0_9 = arith.constant 0 : index
    %c0_10 = arith.constant 0 : index
    %10 = vector.load %arg5[%c0_9, %c0_10] : memref<1x128xf32, #tpu.memory_space<vmem>>, vector<1x128xf32>
    %11 = vector.broadcast %10 : vector<1x128xf32> to vector<8x128xf32>
    %12 = arith.addf %9, %11 : vector<8x128xf32>
    %cst_11 = arith.constant 0.000000e+00 : f32
    %13 = vector.broadcast %cst_11 : f32 to vector<8x128xf32>
    %14 = arith.maximumf %12, %13 : vector<8x128xf32>
    %c0_12 = arith.constant 0 : index
    %c0_13 = arith.constant 0 : index
    %15 = vector.load %arg6[%c0_12, %c0_13] : memref<128x2xf32, #tpu.memory_space<vmem>>, vector<128x2xf32>
    %cst_14 = arith.constant dense<0.000000e+00> : vector<8x2xf32>
    %16 = tpu.matmul %14, %15, %cst_14 {dimension_numbers = #tpu.dot_dimension_numbers<[1], [0], [0], [1], [0, 0, 1, 1], [], []>} : vector<8x128xf32>, vector<128x2xf32>, vector<8x2xf32> -> vector<8x2xf32>
    %c0_15 = arith.constant 0 : index
    %c0_16 = arith.constant 0 : index
    %17 = vector.load %arg7[%c0_15, %c0_16] : memref<1x2xf32, #tpu.memory_space<vmem>>, vector<1x2xf32>
    %18 = vector.broadcast %17 : vector<1x2xf32> to vector<8x2xf32>
    %19 = arith.addf %16, %18 : vector<8x2xf32>
    %c0_17 = arith.constant 0 : index
    %c0_18 = arith.constant 0 : index
    %20 = vector.load %arg8[%c0_17, %c0_18] : memref<8x2xf32, #tpu.memory_space<vmem>>, vector<8x2xf32>
    tpu.vector_store %arg8[%c0_17, %c0_18], %19 {strides = array<i32>} : memref<8x2xf32, #tpu.memory_space<vmem>>, vector<8x2xf32>,
    return
  }
  func.func @transform_0(%arg0: i32) -> (i32, i32) {
    %c0_i32 = arith.constant 0 : i32
    %c0_i32_0 = arith.constant 0 : i32
    return %arg0, %c0_i32 : i32, i32
  }
  func.func @transform_1(%arg0: i32) -> (i32, i32) {
    %c0_i32 = arith.constant 0 : i32
    %c0_i32_0 = arith.constant 0 : i32
    %c0_i32_1 = arith.constant 0 : i32
    return %c0_i32, %c0_i32_0 : i32, i32
  }
  func.func @transform_2(%arg0: i32) -> (i32, i32) {
    %c0_i32 = arith.constant 0 : i32
    %c0_i32_0 = arith.constant 0 : i32
    %c0_i32_1 = arith.constant 0 : i32
    return %c0_i32, %c0_i32_0 : i32, i32
  }
  func.func @transform_3(%arg0: i32) -> (i32, i32) {
    %c0_i32 = arith.constant 0 : i32
    %c0_i32_0 = arith.constant 0 : i32
    %c0_i32_1 = arith.constant 0 : i32
    return %c0_i32, %c0_i32_0 : i32, i32
  }
  func.func @transform_4(%arg0: i32) -> (i32, i32) {
    %c0_i32 = arith.constant 0 : i32
    %c0_i32_0 = arith.constant 0 : i32
    %c0_i32_1 = arith.constant 0 : i32
    return %c0_i32, %c0_i32_0 : i32, i32
  }
  func.func @transform_5(%arg0: i32) -> (i32, i32) {
    %c0_i32 = arith.constant 0 : i32
    %c0_i32_0 = arith.constant 0 : i32
    %c0_i32_1 = arith.constant 0 : i32
    return %c0_i32, %c0_i32_0 : i32, i32
  }
  func.func @transform_6(%arg0: i32) -> (i32, i32) {
    %c0_i32 = arith.constant 0 : i32
    %c0_i32_0 = arith.constant 0 : i32
    %c0_i32_1 = arith.constant 0 : i32
    return %c0_i32, %c0_i32_0 : i32, i32
  }
  func.func @transform_7(%arg0: i32) -> (i32, i32) {
    %c0_i32 = arith.constant 0 : i32
    %c0_i32_0 = arith.constant 0 : i32
    return %arg0, %c0_i32 : i32, i32
  }
}

</mosaic_0001>

<bundles_post_ra>
// kernel: tpu_custom_call.1
= control target key start
LH: loop header
LB: loop body
LE: loop exit
PB: predicated region body
PF: predicated region fallthrough
CT: control target
= control target key end

     0   :  { %vm39_vm0 = vcmask 1043456   ;;  %vm35_vm1 = vcmask 31744   ;;  %v474_v0 = vmov 0.0   ;;  %vm475_vm2 = vmmov 0   ;;  %s647_s1 = inlined_call_operand.vmem [shape: f32[4,128], index: 1, kind: input, shape index: {}]   ;;  %s648_s0 = inlined_call_operand.vmem [shape: f32[8,4], index: 0, kind: input, shape index: {}]   ;;  %s649_s3 = inlined_call_operand.vmem [shape: f32[128,128], index: 3, kind: input, shape index: {}]   ;;  %s650_s5 = inlined_call_operand.vmem [shape: f32[128,2], index: 5, kind: input, shape index: {}]   ;;  %s651_s2 = inlined_call_operand.vmem [shape: f32[1,128], index: 2, kind: input, shape index: {}]   ;;  %s652_s4 = inlined_call_operand.vmem [shape: f32[1,128], index: 4, kind: input, shape index: {}]   ;;  %s653_s6 = inlined_call_operand.vmem [shape: f32[1,2], index: 6, kind: input, shape index: {}]   ;;  %s654_s7 = inlined_call_operand.vmem [shape: f32[8,2], index: 7, kind: output, shape index: {}]  }
   0x1   :  { %348 = vmatprep.subr.mxu0 %v474_v0  ;;  %v27_v1 = vld [vmem:[%s647_s1] sm:$0xf]  ;;  %350 = vmatprep.mubr.msk.f32.mxu0 %vm475_vm2, %v474_v0  ;;  %v476_v4 = vmov 0.0|0.0   ;;  %v115_v5 = vld [vmem:[%s649_s3 + $0x8] sm:$0xff]  ;;  %v116_v6 = vld [vmem:[%s649_s3 + $0x10] sm:$0xff]  ;;  %vm301_vm3 = vcmask 15360  }
   0x2   :  { %v26_v2 = vld [vmem:[%s648_s0] sm:$0xff]  ;;  %349 = vmatpush3.msk.msra.mxu0 %vm39_vm0, %v27_v1  ;;  %423 = vmatprep.subr.bf16.mxu1 %v476_v4  ;;  %v117_v7 = vld [vmem:[%s649_s3 + $0x18] sm:$0xff]  ;;  %v119_v11 = vld [vmem:[%s649_s3 + $0x28] sm:$0xff] }
   0x3   :  { %v114_v3 = vld [vmem:[%s649_s3] sm:$0xff]  ;;  %351 = vmatmul.mubr.msk.f32.vlgmr.msra.gmra.mrb[0].mxu0 %vm35_vm1, %v26_v2  ;;  %385 = vmatprep.mubr.msk.f32.mxu1 %vm475_vm2, %v474_v0  ;;  %v427_v9 = vpack.c.bf16 %v117_v7, %v116_v6  ;;  %v120_v13 = vld [vmem:[%s649_s3 + $0x30] sm:$0xff]  ;;  %v121_v14 = vld [vmem:[%s649_s3 + $0x38] sm:$0xff] }
   0x4   :  { %v424_v8 = vpack.c.bf16 %v115_v5, %v114_v3  ;;  %447 = vmatprep.subr.bf16.mxu0 %v476_v4  ;;  %420 = vmatprep.mubr.msk.f32.mxu0 %vm475_vm2, %v474_v0  ;;  %v118_v10 = vld [vmem:[%s649_s3 + $0x20] sm:$0xff]  ;;  %v433_v15 = vpack.c.bf16 %v121_v14, %v120_v13  ;;  %v123_v17 = vld [vmem:[%s649_s3 + $0x48] sm:$0xff]  ;;  %v124_v19 = vld [vmem:[%s649_s3 + $0x50] sm:$0xff] }
   0x5   :  { %v430_v12 = vpack.c.bf16 %v119_v11, %v118_v10  ;;  %v122_v16 = vld [vmem:[%s649_s3 + $0x40] sm:$0xff]  ;;  %v125_v20 = vld [vmem:[%s649_s3 + $0x58] sm:$0xff]  ;;  %v127_v23 = vld [vmem:[%s649_s3 + $0x68] sm:$0xff] }
   0x6   :  { %425 = vmatpush3.bf16.msra.mxu1 %v424_v8  ;;  %v436_v18 = vpack.c.bf16 %v123_v17, %v122_v16  ;;  %v439_v21 = vpack.c.bf16 %v125_v20, %v124_v19  ;;  %v126_v22 = vld [vmem:[%s649_s3 + $0x60] sm:$0xff]  ;;  %v128_v25 = vld [vmem:[%s649_s3 + $0x70] sm:$0xff]  ;;  %v129_v26 = vld [vmem:[%s649_s3 + $0x78] sm:$0xff] }
   0x7   :  { %426 = vmatprep.subr.bf16.mxu1 %v476_v4  ;;  %v442_v24 = vpack.c.bf16 %v127_v23, %v126_v22  ;;  %v445_v27 = vpack.c.bf16 %v129_v26, %v128_v25  ;;  %v208_v28 = vld [vmem:[%s650_s5] sm:$0xff]  ;;  %v209_v29 = vld [vmem:[%s650_s5 + $0x8] sm:$0xff]  ;;  %v210_v30 = vld [vmem:[%s650_s5 + $0x10] sm:$0xff] }
   0x8   :  { %v448_v31 = vpack.c.bf16 %v209_v29, %v208_v28  ;;  %v211_v32 = vld [vmem:[%s650_s5 + $0x18] sm:$0xff]  ;;  %v212_v34 = vld [vmem:[%s650_s5 + $0x20] sm:$0xff]  ;;  %v213_v35 = vld [vmem:[%s650_s5 + $0x28] sm:$0xff] }
   0x9   :  { %v451_v33 = vpack.c.bf16 %v211_v32, %v210_v30  ;;  %v454_v36 = vpack.c.bf16 %v213_v35, %v212_v34  ;;  %v214_v37 = vld [vmem:[%s650_s5 + $0x30] sm:$0xff]  ;;  %v215_v38 = vld [vmem:[%s650_s5 + $0x38] sm:$0xff]  ;;  %v216_v40 = vld [vmem:[%s650_s5 + $0x40] sm:$0xff] }
   0xa   :  { %428 = vmatpush3.bf16.msra.mxu1 %v427_v9  ;;  %449 = vmatpush3.bf16.msra.mxu0 %v448_v31  ;;  %v457_v39 = vpack.c.bf16 %v215_v38, %v214_v37  ;;  %v217_v41 = vld [vmem:[%s650_s5 + $0x48] sm:$0xff]  ;;  %v218_v43 = vld [vmem:[%s650_s5 + $0x50] sm:$0xff]  ;;  %v219_v44 = vld [vmem:[%s650_s5 + $0x58] sm:$0xff] }
   0xb   :  { %429 = vmatprep.subr.bf16.mxu1 %v476_v4  ;;  %450 = vmatprep.subr.bf16.mxu0 %v476_v4  ;;  %v460_v42 = vpack.c.bf16 %v217_v41, %v216_v40  ;;  %v463_v45 = vpack.c.bf16 %v219_v44, %v218_v43  ;;  %v220_v46 = vld [vmem:[%s650_s5 + $0x60] sm:$0xff]  ;;  %v221_v47 = vld [vmem:[%s650_s5 + $0x68] sm:$0xff]  ;;  %v222_v54 = vld [vmem:[%s650_s5 + $0x70] sm:$0xff] }
   0xc   :  { %v466_v48 = vpack.c.bf16 %v221_v47, %v220_v46  ;;  %v307_v49 = vld [vmem:[%s651_s2] ss:$0 sm:$0xff]  ;;  %v223_v55 = vld [vmem:[%s650_s5 + $0x78] sm:$0xff] }
   0xd   :  { %v469_v56 = vpack.c.bf16 %v223_v55, %v222_v54  ;;  %v310_v57 = vld [vmem:[%s652_s4] ss:$0 sm:$0xff] }
   0xe   :  { %431 = vmatpush3.bf16.msra.mxu1 %v430_v12  ;;  %452 = vmatpush3.bf16.msra.mxu0 %v451_v33  ;;  %v311_v62 = vld [vmem:[%s653_s6] ss:$0 sm:$0xff] }
   0xf   :  { %432 = vmatprep.subr.bf16.mxu1 %v476_v4  ;;  %453 = vmatprep.subr.bf16.mxu0 %v476_v4 }
  0x12   :  { %434 = vmatpush3.bf16.msra.mxu1 %v433_v15  ;;  %455 = vmatpush3.bf16.msra.mxu0 %v454_v36 }
  0x13   :  { %435 = vmatprep.subr.bf16.mxu1 %v476_v4  ;;  %456 = vmatprep.subr.bf16.mxu0 %v476_v4 }
  0x16   :  { %437 = vmatpush3.bf16.msra.mxu1 %v436_v18  ;;  %458 = vmatpush3.bf16.msra.mxu0 %v457_v39 }
  0x17   :  { %438 = vmatprep.subr.bf16.mxu1 %v476_v4  ;;  %459 = vmatprep.subr.bf16.mxu0 %v476_v4 }
  0x1a   :  { %440 = vmatpush3.bf16.msra.mxu1 %v439_v21  ;;  %461 = vmatpush3.bf16.msra.mxu0 %v460_v42 }
  0x1b   :  { %441 = vmatprep.subr.bf16.mxu1 %v476_v4  ;;  %462 = vmatprep.subr.bf16.mxu0 %v476_v4 }
  0x1e   :  { %443 = vmatpush3.bf16.msra.mxu1 %v442_v24  ;;  %464 = vmatpush3.bf16.msra.mxu0 %v463_v45 }
  0x1f   :  { %444 = vmatprep.subr.bf16.mxu1 %v476_v4  ;;  %465 = vmatprep.subr.bf16.mxu0 %v476_v4 }
  0x22   :  { %446 = vmatpush3.bf16.msra.mxu1 %v445_v27  ;;  %467 = vmatpush3.bf16.msra.mxu0 %v466_v48 }
  0x23   :  { %468 = vmatprep.subr.bf16.mxu0 %v476_v4 }
  0x26   :  { %470 = vmatpush3.bf16.msra.mxu0 %v469_v56 }
  0xd6   :  { %v109_v50 = vpop.f32.mrb[0].mxu0 }
  0xd7   :  { %v110_v51 = vadd.f32 %v307_v49, %v109_v50  ;;  %v352_v52 = vpop.f32.mrb[1].mxu0 }
  0xd9   :  { %v113_v53 = vmax.f32 %v110_v51, 0.0 }
  0xdb   :  { %386 = vmatmul.mubr.f32.vlgmr.msra.gmra.mrb[0].mxu1 %v113_v53 }
 0x1ae   :  { %v203_v58 = vpop.f32.mrb[0].mxu1 }
 0x1af   :  { %v204_v59 = vadd.f32 %v310_v57, %v203_v58  ;;  %v387_v60 = vpop.f32.mrb[1].mxu1 }
 0x1b1   :  { %v207_v61 = vmax.f32 %v204_v59, 0.0 }
 0x1b3   :  { %421 = vmatmul.mubr.f32.vlgmr.msra.gmra.mrb[2].mxu0 %v207_v61 }
 0x286   :  { %v297_v63 = vpop.f32.mrb[2].mxu0 }
 0x287   :  { %v298_v0 = vadd.f32 %v311_v62, %v297_v63  ;;  %v422_v1 = vpop.f32.mrb[3].mxu0 }
 0x289   :  { %302 = vst.msk [vmem:[%s654_s7] sm:$0xff] %vm301_vm3, %v298_v0 }

</bundles_post_ra>
